<compile_context>
chip_gen: v7x
topology: tpu7x:2x2x1
jax: 0.10.0
libtpu: 0.0.40
codegen_flags: <defaults>
</compile_context>

<pallas_src>
import jax
import jax.numpy as jnp
from jax.experimental import pallas as pl
from jax.experimental.pallas import tpu as pltpu


def _patch_embed_kernel(x_ref, w_ref, b_ref, o_ref):
    # x_ref: (tm, K), w_ref: (K, tn), b_ref: (1, tn) f32, o_ref: (tm, tn).
    acc = jnp.dot(x_ref[...], w_ref[...], preferred_element_type=jnp.float32)
    o_ref[...] = (acc + b_ref[...]).astype(o_ref.dtype)


def _round_up(v, m):
    return (v + m - 1) // m * m


def _pick_row_tile(M, tm_target):
    """Pick a row tile (multiple of 8 sublanes) that divides round_up(M, 8) if
    possible, so no jnp.pad on X and no trailing row-slice on the output is
    needed (each costs a full extra HBM pass on this memory-bound op)."""
    m8 = _round_up(M, 8)
    cap = max(8, (min(tm_target, m8) // 8) * 8)
    for t in range(cap, 7, -8):
        if m8 % t == 0:
            if 4 * t >= cap:            # large enough divisor: no extra padding
                return t, m8
            break
    return cap, _round_up(M, cap)       # fall back: pad rows, slice afterwards


def patch_embeddings(x, weight, bias, patch_size, *,
                     compute_dtype=jnp.bfloat16,
                     out_dtype=None,
                     tm_target=512,
                     tn_target=512,
                     resident_n_limit=4096):
    """ViT patch embedding: Conv2d(C, hidden, kernel=stride=P) -> flatten(2)
    -> transpose(1, 2).

    x: (B, C, H, W) NCHW.  weight: (hidden, C, P, P).  bias: (hidden,).
    Returns (B, num_patches, hidden) in out_dtype (default: x.dtype).

    compute_dtype is the matmul-operand dtype (accumulation is always f32 on
    the MXU).  bf16 is the recommended / default production setting -- the op
    is HBM-bound on v6e/v7x and MXU-bound in f32 on v5e; pass jnp.float32 for
    bit-exact Conv2d semantics.
    """
    B, C, H, W = x.shape
    P = patch_size
    hidden = weight.shape[0]
    Hp, Wp = H // P, W // P
    num_patches = Hp * Wp
    if out_dtype is None:
        out_dtype = x.dtype

    # ---- glue: non-overlapping patch extraction (pure relayout) ----
    # Cast BEFORE the relayout so a materialized transpose pass moves half the
    # bytes when compute_dtype is bf16.
    xc = x.astype(compute_dtype)
    # (B, C, Hp, P, Wp, P) -> (B, Hp, Wp, C, P, P) -> (B*num_patches, C*P*P);
    # column order (c, ph, pw) matches the Conv2d weight flattening below.
    xp = xc.reshape(B, C, Hp, P, Wp, P)
    xp = jnp.transpose(xp, (0, 2, 4, 1, 3, 5))
    xp = xp.reshape(B * num_patches, C * P * P)

    # Conv weight (hidden, C, P, P) -> (C*P*P, hidden) so the kernel does X @ W.
    w_mat = weight.astype(compute_dtype).reshape(hidden, C * P * P).T
    b_mat = bias.reshape(1, hidden).astype(jnp.float32)   # exact f32 epilogue add

    M, K = xp.shape
    N = hidden

    # ---- tiling: lane-dense output, weight fully resident ----
    tm, M_pad = _pick_row_tile(M, tm_target)
    N_pad = _round_up(N, 128)

    if N_pad <= resident_n_limit:
        # Primary path: N un-tiled.  W / bias block indices are constant across
        # the 1-D grid over M, so Pallas fetches them exactly once and only the
        # X / out row tiles stream through HBM.  Grid steps = M_pad // tm.
        tn = N_pad
        grid = (M_pad // tm,)
        in_specs = [
            pl.BlockSpec((tm, K), lambda i: (i, 0)),    # X row tile (streams)
            pl.BlockSpec((K, tn), lambda i: (0, 0)),    # W (resident, 1 DMA)
            pl.BlockSpec((1, tn), lambda i: (0, 0)),    # bias (resident)
        ]
        out_specs = pl.BlockSpec((tm, tn), lambda i: (i, 0))
        dim_sem = ("parallel",)                         # megacore shards M (v7x)
    else:
        # Fallback for very large hidden only: tile N too (tn a multiple of 256
        # so the v6e/v7x 2x256 MXU columns stay filled).  W is re-streamed per
        # row tile in this mode -- acceptable only because it cannot be made
        # resident anyway.
        tn = max(256, (min(tn_target, N_pad) // 256) * 256)
        N_pad = _round_up(N, tn)
        grid = (M_pad // tm, N_pad // tn)
        in_specs = [
            pl.BlockSpec((tm, K), lambda i, j: (i, 0)),
            pl.BlockSpec((K, tn), lambda i, j: (0, j)),
            pl.BlockSpec((1, tn), lambda i, j: (0, j)),
        ]
        out_specs = pl.BlockSpec((tm, tn), lambda i, j: (i, j))
        dim_sem = ("parallel", "parallel")

    # ---- pad only when strictly needed ----
    if M_pad != M:
        xp = jnp.pad(xp, ((0, M_pad - M), (0, 0)))       # rare: tile divides M_pad
    if N_pad != N:
        w_mat = jnp.pad(w_mat, ((0, 0), (0, N_pad - N)))  # small (K x N)
        b_mat = jnp.pad(b_mat, ((0, 0), (0, N_pad - N)))

    in_itemsize = jnp.dtype(compute_dtype).itemsize
    out_itemsize = jnp.dtype(out_dtype).itemsize
    cost = pl.CostEstimate(
        flops=2 * M_pad * K * N_pad,
        transcendentals=0,
        bytes_accessed=(M_pad * K * in_itemsize        # X read once
                        + K * N_pad * in_itemsize      # W read once (resident)
                        + N_pad * 4                    # bias
                        + M_pad * N_pad * out_itemsize),
    )

    # Double-buffered X / out tiles + W (resident, but 2 buffers are allocated).
    vmem_est = (2 * tm * K * in_itemsize + 2 * tm * tn * out_itemsize
                + 2 * K * tn * in_itemsize + 2 * tn * 4)
    compiler_kwargs = {}
    if vmem_est > 14 * 1024 * 1024:       # above v5e's default scoped VMEM
        compiler_kwargs["vmem_limit_bytes"] = int(vmem_est * 5 // 4)

    out = pl.pallas_call(
        _patch_embed_kernel,
        out_shape=jax.ShapeDtypeStruct((M_pad, N_pad), out_dtype),
        grid_spec=pltpu.PrefetchScalarGridSpec(
            num_scalar_prefetch=0,
            grid=grid,
            in_specs=in_specs,
            out_specs=out_specs,
        ),
        compiler_params=pltpu.CompilerParams(
            dimension_semantics=dim_sem, **compiler_kwargs),
        cost_estimate=cost,
    )(xp, w_mat, b_mat)

    if M_pad != M or N_pad != N:
        out = out[:M, :N]
    return out.reshape(B, num_patches, hidden)


if __name__ == "__main__":
    # Small config consistent with the module's forward.
    config = dict(image_size=16, patch_size=4, num_channels=4, hidden_size=32)
    B = 2
    C = config["num_channels"]
    S = config["image_size"]
    P = config["patch_size"]
    Hdn = config["hidden_size"]

    key = jax.random.PRNGKey(0)
    kx, kw, kb = jax.random.split(key, 3)

    # Deterministic Conv2d-style uniform init (bound 1/sqrt(fan_in)).
    fan_in = C * P * P
    bound = 1.0 / (fan_in ** 0.5)
    weight = jax.random.uniform(kw, (Hdn, C, P, P), jnp.float32, -bound, bound)
    bias = jax.random.uniform(kb, (Hdn,), jnp.float32, -bound, bound)
    x = jax.random.normal(kx, (B, C, S, S), jnp.float32)

    # Reference: Conv2d -> flatten(2) -> transpose(1, 2).
    ref = jax.lax.conv_general_dilated(
        x, weight, window_strides=(P, P), padding="VALID",
        dimension_numbers=("NCHW", "OIHW", "NCHW"))
    ref = ref + bias[None, :, None, None]
    ref = ref.reshape(B, Hdn, -1).transpose(0, 2, 1)

    # Exact-semantics f32 path.
    out_f32 = patch_embeddings(x, weight, bias, P, compute_dtype=jnp.float32)
    out_f32 = jax.block_until_ready(out_f32)
    assert out_f32.shape == (B, (S // P) ** 2, Hdn)
    assert jnp.allclose(out_f32, ref, atol=1e-5, rtol=1e-5)

    # Default path: bf16 operands, f32 accumulation (looser tolerance by design).
    out_def = patch_embeddings(x, weight, bias, P)
    out_def = jax.block_until_ready(out_def)
    assert out_def.shape == (B, (S // P) ** 2, Hdn)
    assert jnp.allclose(out_def, ref, atol=1e-1, rtol=1e-1)

    print("KERNEL_OK")
</pallas_src>

<mosaic_0001>
module attributes {stable_mosaic.version = 11 : i64} {
  func.func @_patch_embed_kernel(%arg0: i32, %arg1: memref<32x64xf32, #tpu.memory_space<vmem>>, %arg2: memref<64x128xf32, #tpu.memory_space<vmem>>, %arg3: memref<1x128xf32, #tpu.memory_space<vmem>>, %arg4: memref<32x128xf32, #tpu.memory_space<vmem>>) attributes {dimension_semantics = [#tpu.dimension_semantics<parallel>], iteration_bounds = array<i64: 1>, scalar_prefetch = 0 : i64, scratch_operands = 0 : i64, tpu.core_type = #tpu.core_type<tc>, window_params = [{transform_indices = @transform_0, window_bounds = array<i64: 32, 64>}, {pipeline_mode = #tpu.pipeline_mode<synchronous>, transform_indices = @transform_1, window_bounds = array<i64: 64, 128>}, {pipeline_mode = #tpu.pipeline_mode<synchronous>, transform_indices = @transform_2, window_bounds = array<i64: 1, 128>}, {transform_indices = @transform_3, window_bounds = array<i64: 32, 128>}]} {
    %c0 = arith.constant 0 : index
    %c0_0 = arith.constant 0 : index
    %0 = vector.load %arg1[%c0, %c0_0] : memref<32x64xf32, #tpu.memory_space<vmem>>, vector<32x64xf32>
    %c0_1 = arith.constant 0 : index
    %c0_2 = arith.constant 0 : index
    %1 = vector.load %arg2[%c0_1, %c0_2] : memref<64x128xf32, #tpu.memory_space<vmem>>, vector<64x128xf32>
    %cst = arith.constant dense<0.000000e+00> : vector<32x128xf32>
    %2 = tpu.matmul %0, %1, %cst {dimension_numbers = #tpu.dot_dimension_numbers<[1], [0], [0], [1], [0, 0, 1, 1], [], []>} : vector<32x64xf32>, vector<64x128xf32>, vector<32x128xf32> -> vector<32x128xf32>
    %c0_3 = arith.constant 0 : index
    %c0_4 = arith.constant 0 : index
    %3 = vector.load %arg3[%c0_3, %c0_4] : memref<1x128xf32, #tpu.memory_space<vmem>>, vector<1x128xf32>
    %4 = vector.broadcast %3 : vector<1x128xf32> to vector<32x128xf32>
    %5 = arith.addf %2, %4 : vector<32x128xf32>
    %c0_5 = arith.constant 0 : index
    %c0_6 = arith.constant 0 : index
    %6 = vector.load %arg4[%c0_5, %c0_6] : memref<32x128xf32, #tpu.memory_space<vmem>>, vector<32x128xf32>
    tpu.vector_store %arg4[%c0_5, %c0_6], %5 {strides = array<i32>} : memref<32x128xf32, #tpu.memory_space<vmem>>, vector<32x128xf32>,
    return
  }
  func.func @transform_0(%arg0: i32) -> (i32, i32) {
    %c0_i32 = arith.constant 0 : i32
    %c0_i32_0 = arith.constant 0 : i32
    return %arg0, %c0_i32 : i32, i32
  }
  func.func @transform_1(%arg0: i32) -> (i32, i32) {
    %c0_i32 = arith.constant 0 : i32
    %c0_i32_0 = arith.constant 0 : i32
    %c0_i32_1 = arith.constant 0 : i32
    return %c0_i32, %c0_i32_0 : i32, i32
  }
  func.func @transform_2(%arg0: i32) -> (i32, i32) {
    %c0_i32 = arith.constant 0 : i32
    %c0_i32_0 = arith.constant 0 : i32
    %c0_i32_1 = arith.constant 0 : i32
    return %c0_i32, %c0_i32_0 : i32, i32
  }
  func.func @transform_3(%arg0: i32) -> (i32, i32) {
    %c0_i32 = arith.constant 0 : i32
    %c0_i32_0 = arith.constant 0 : i32
    return %arg0, %c0_i32 : i32, i32
  }
}

</mosaic_0001>

<bundles_post_ra>
// kernel: tpu_custom_call.1
= control target key start
LH: loop header
LB: loop body
LE: loop exit
PB: predicated region body
PF: predicated region fallthrough
CT: control target
= control target key end

     0   :  { %8 = vsyncpa [#allocation3], 0  ;;  %s399_s0 = inlined_call_operand.hbm [shape: f32[32,64], index: 0, kind: input, shape index: {}]   ;;  %s400_s1 = inlined_call_operand.hbm [shape: f32[64,128], index: 1, kind: input, shape index: {}]   ;;  %s401_s2 = inlined_call_operand.vmem [shape: f32[1,128], index: 2, kind: input, shape index: {}]   ;;  %s402_s3 = inlined_call_operand.hbm [shape: f32[32,128], index: 3, kind: output, shape index: {}]  }
   0x1   :  { %9 = vsyncpa [#allocation6], 0 }
   0x2   :  { %10 = vsyncpa [#allocation4], 0  ;;  %s322_s12 = smov [#allocation2]   ;;  %s250_s16 = scalar_lea.hbm %s399_s0, 512 }
   0x3   :  { %s16_s13 = sshll.u32 %s322_s12, 4  ;;  %p251_p0 = scmp.ne.s32.totalorder %s399_s0, %s250_s16  ;;  %s17_s13 = int_to_ptr.vmem [resolvable:$true] %s16_s13 }
   0x4   :  { %p254_p1 = scmp.lt.u32.totalorder %s250_s16, %s399_s0 }
   0x6   :  { %p256_p2 = pnand %p254_p1, %p251_p0 }
   0x8   :  { %259 = shalt.err (!%p256_p2)
}
   0x9   :  { %s260_s21 = scalar_lea.vmem %s17_s13, 512  ;;  %p265_p4 = scmp.lt.s32.totalorder %s17_s13, %s17_s13 }
   0xa   :  { %p261_p3 = scmp.ne.s32.totalorder %s17_s13, %s260_s21  ;;  %p266_p5 = scmp.lt.s32.totalorder %s260_s21, %s260_s21 }
   0xc   :  { %p267_p6 = por %p266_p5, %p265_p4 }
   0xe   :  { %p268_p7 = pnand %p267_p6, %p261_p3 }
  0x10   :  { %271 = shalt.err (!%p268_p7)
}
  0x11   :  { %s323_s22 = smov 128   ;;  %s324_s23 = smov 8  }
  0x12   :  { %22 = dma.hbm_to_vmem [thread:$0]  %s399_s0, 512, %s17_s13, [#allocation3], %s323_s22, %s323_s22, %s324_s23  }
  0x13   :  { %s325_s26 = smov [#allocation5]   ;;  %s272_s30 = scalar_lea.hbm %s400_s1, 1024 }
  0x14   :  { %s28_s27 = sshll.u32 %s325_s26, 4  ;;  %p273_p8 = scmp.ne.s32.totalorder %s400_s1, %s272_s30  ;;  %s29_s27 = int_to_ptr.vmem [resolvable:$true] %s28_s27 }
  0x15   :  { %p276_p9 = scmp.lt.u32.totalorder %s272_s30, %s400_s1 }
  0x17   :  { %p278_p10 = pnand %p276_p9, %p273_p8 }
  0x19   :  { %281 = shalt.err (!%p278_p10)
}
  0x1a   :  { %s282_s8 = scalar_lea.vmem %s29_s27, 1024  ;;  %p287_p12 = scmp.lt.s32.totalorder %s29_s27, %s29_s27 }
  0x1b   :  { %p283_p11 = scmp.ne.s32.totalorder %s29_s27, %s282_s8  ;;  %p288_p13 = scmp.lt.s32.totalorder %s282_s8, %s282_s8 }
  0x1d   :  { %p289_p0 = por %p288_p13, %p287_p12 }
  0x1f   :  { %p290_p1 = pnand %p289_p0, %p283_p11 }
  0x21   :  { %293 = shalt.err (!%p290_p1)
}
  0x22   :  { %34 = dma.hbm_to_vmem [thread:$0]  %s400_s1, 1024, %s29_s27, [#allocation6], %s323_s22, %s323_s22, %s324_s23  }
  0x23   :  { %316 = dma.done.wait [#allocation3], 512  }
  0x24   :  { %317 = vsyncadd [#allocation3], 4294966784 }
  0x25   :  { %318 = dma.done.wait [#allocation6], 1024  }
  0x26   :  { %319 = vsyncadd [#allocation6], 4294966272  ;;  %v47_v0 = vld [vmem:[#allocation5] sm:$0xff]  ;;  %v48_v1 = vld [vmem:[#allocation5 + $0x8] sm:$0xff]  ;;  %vm62_vm0 = vcmask 523264   ;;  %s326_s11 = smov [#allocation7]  }
  0x27   :  { %v49_v2 = vld [vmem:[#allocation5 + $0x10] sm:$0xff]  ;;  %v221_v3 = vpack.c.bf16 %v48_v1, %v47_v0  ;;  %v50_v4 = vld [vmem:[#allocation5 + $0x18] sm:$0xff]  ;;  %v51_v6 = vld [vmem:[#allocation5 + $0x20] sm:$0xff]  ;;  %s169_s12 = sshll.u32 %s326_s11, 4  ;;  %s170_s12 = int_to_ptr.vmem [resolvable:$true] %s169_s12 }
  0x28   :  { %v225_v5 = vpack.c.bf16 %v50_v4, %v49_v2  ;;  %v52_v7 = vld [vmem:[#allocation5 + $0x28] sm:$0xff]  ;;  %v43_v8 = vld [vmem:[#allocation2] sm:$0xff]  ;;  %v45_v9 = vld [vmem:[#allocation2 + $0x10] sm:$0xff]  ;;  %s294_s13 = scalar_lea.vmem %s170_s12, 512  ;;  %p299_p3 = scmp.lt.s32.totalorder %s170_s12, %s170_s12 }
  0x29   :  { %222 = vmatprep.subr.bf16.mxu0 %v221_v3  ;;  %237 = vmatprep.subr.bf16.mxu1 %v221_v3  ;;  %v229_v10 = vpack.c.bf16 %v52_v7, %v51_v6  ;;  %v53_v11 = vld [vmem:[#allocation5 + $0x30] sm:$0xff]  ;;  %v54_v12 = vld [vmem:[#allocation5 + $0x38] sm:$0xff]  ;;  %v44_v14 = vld [vmem:[#allocation2 + $0x8] sm:$0xff]  ;;  %p295_p2 = scmp.ne.s32.totalorder %s170_s12, %s294_s13  ;;  %p300_p4 = scmp.lt.s32.totalorder %s294_s13, %s294_s13 }
  0x2a   :  { %224 = vmatpush3.bf16.msra.mxu0 %v221_v3  ;;  %241 = vmatpush3.bf16.msra.mxu1 %v221_v3  ;;  %v233_v13 = vpack.c.bf16 %v54_v12, %v53_v11  ;;  %v46_v15 = vld [vmem:[#allocation2 + $0x18] sm:$0xff]  ;;  %v182_v16 = vld [vmem:[%s401_s2] ss:$0 sm:$0xff] }
  0x2b   :  { %226 = vmatprep.subr.bf16.mxu0 %v225_v5  ;;  %238 = vmatprep.subr.bf16.mxu1 %v225_v5  ;;  %p301_p5 = por %p300_p4, %p299_p3 }
  0x2c   :  { %215 = vmatprep.mubr.msk.f32.mxu0 %vm62_vm0, %v43_v8  ;;  %218 = vmatprep.mubr.msk.f32.mxu1 %vm62_vm0, %v45_v9 }
  0x2d   :  { %p302_p6 = pnand %p301_p5, %p295_p2 }
  0x2e   :  { %228 = vmatpush3.bf16.msra.mxu0 %v225_v5  ;;  %242 = vmatpush3.bf16.msra.mxu1 %v225_v5 }
  0x2f   :  { %230 = vmatprep.subr.bf16.mxu0 %v229_v10  ;;  %239 = vmatprep.subr.bf16.mxu1 %v229_v10 }
  0x32   :  { %232 = vmatpush3.bf16.msra.mxu0 %v229_v10  ;;  %243 = vmatpush3.bf16.msra.mxu1 %v229_v10 }
  0x33   :  { %234 = vmatprep.subr.bf16.mxu0 %v233_v13  ;;  %240 = vmatprep.subr.bf16.mxu1 %v233_v13 }
  0x36   :  { %236 = vmatpush3.bf16.msra.mxu0 %v233_v13  ;;  %244 = vmatpush3.bf16.msra.mxu1 %v233_v13 }
  0x39   :  { %216 = vmatmul.mubr.msk.f32.vlgmr.msra.gmra.mrb[0].mxu0 %vm62_vm0, %v44_v14  ;;  %219 = vmatmul.mubr.msk.f32.vlgmr.msra.gmra.mrb[0].mxu1 %vm62_vm0, %v46_v15 }
 0x10c   :  { %v217_v17 = vpop.f32.mrb[0].mxu0  ;;  %v220_v18 = vpop.f32.mrb[0].mxu1 }
 0x10d   :  { %v147_v19 = vadd.f32 %v217_v17, %v182_v16  ;;  %v157_v20 = vadd.f32 %v220_v18, %v182_v16  ;;  %v141_v21 = vpop.f32.mrb[1].mxu0  ;;  %v151_v22 = vpop.f32.mrb[1].mxu1 }
 0x10e   :  { %v142_v23 = vadd.f32 %v182_v16, %v141_v21  ;;  %v152_v24 = vadd.f32 %v182_v16, %v151_v22 }
 0x10f   :  { %161 = vst [vmem:[#allocation7 + $0x8] sm:$0xff] %v147_v19  ;;  %163 = vst [vmem:[#allocation7 + $0x18] sm:$0xff] %v157_v20 }
 0x110   :  { %160 = vst [vmem:[#allocation7] sm:$0xff] %v142_v23  ;;  %162 = vst [vmem:[#allocation7 + $0x10] sm:$0xff] %v152_v24 }
 0x111   :  { %305 = shalt.err (!%p302_p6)
}
 0x112   :  { %s306_s15 = scalar_lea.hbm %s402_s3, 512 }
 0x113   :  { %p307_p7 = scmp.ne.s32.totalorder %s402_s3, %s306_s15  ;;  %p310_p8 = scmp.lt.u32.totalorder %s306_s15, %s402_s3 }
 0x115   :  { %p312_p9 = pnand %p310_p8, %p307_p7 }
 0x117   :  { %315 = shalt.err (!%p312_p9)
}
 0x118   :  { %175 = dma.vmem_to_hbm [thread:$0]  %s170_s12, 512, %s402_s3, [#allocation4], %s323_s22, %s323_s22, %s324_s23  }
 0x119   :  { %320 = dma.done.wait [#allocation4], 512  }
 0x11a   :  { %321 = vsyncadd [#allocation4], 4294966784 }
 0x11b   :  { %179 = vsyncpa [#allocation3], 1 }
 0x11c   :  { %180 = vsyncpa [#allocation6], 1 }
 0x11d   :  { %181 = vsyncpa [#allocation4], 1 }

</bundles_post_ra>
